<compile_context>
chip_gen: v6e
topology: v6e:2x2x1
jax: 0.10.0
libtpu: 0.0.40
codegen_flags: <defaults>
</compile_context>

<pallas_src>
import jax
import jax.numpy as jnp
from jax import lax
from jax.experimental import pallas as pl
from jax.experimental.pallas import tpu as pltpu


# ---------------------------------------------------------------------------
# Fused retrieval-head kernel
#   inputs : last_pos (B,) i32 SMEM, image_query (B,Dv) bf16, w_v (Dv,E) bf16,
#            b_v (1,E) f32, text_hidden (B,S,Dt) f32 in HBM (pl.ANY),
#            w_t (Dt,E) bf16, b_t (1,E) f32, idx_col (B,1) i32, idx_row (1,B) i32,
#            inv_temp (1,) f32 SMEM
#   output : loss (1,1) f32 SMEM
#   scratch: pooled (B,Dt) f32 VMEM, DMA sems (B,)
# ---------------------------------------------------------------------------
def retrieval_head_kernel(last_pos_ref, img_ref, wv_ref, bv_ref,
                          hid_hbm, wt_ref, bt_ref,
                          idx_col_ref, idx_row_ref, inv_temp_ref,
                          loss_ref, pooled_buf, copy_sem):
    f32, bf16 = jnp.float32, jnp.bfloat16
    B, Dt = pooled_buf.shape

    def l2norm(y):
        # F.normalize(y, dim=-1): y / max(||y||, 1e-12) == y * rsqrt(max(sumsq, 1e-24))
        sumsq = jnp.sum(y * y, axis=-1, keepdims=True)
        return y * lax.rsqrt(jnp.maximum(sumsq, f32(1e-24)))

    # ---- text pooled-token row gather: pooled[b] = hidden[b, last_pos[b], :] ----
    # B tiny DMAs straight from HBM; the full (B,S,Dt) tensor never enters VMEM.
    copies = []
    for b in range(B):                     # B is small & static -> unrolled issue
        cp = pltpu.make_async_copy(
            hid_hbm.at[b, pl.ds(last_pos_ref[b], 1), :],
            pooled_buf.at[pl.ds(b, 1), :],
            copy_sem.at[b])
        cp.start()
        copies.append(cp)

    # ---- vision branch (overlaps with the gather DMAs): Linear + L2 norm ----
    v = jnp.dot(img_ref[...], wv_ref[...], preferred_element_type=f32) + bv_ref[...]
    v = l2norm(v)

    for cp in copies:
        cp.wait()

    # ---- text branch: Linear + L2 norm ----
    pooled_bf = pooled_buf[...].astype(bf16)
    t = jnp.dot(pooled_bf, wt_ref[...], preferred_element_type=f32) + bt_ref[...]
    t = l2norm(t)

    # ---- contrastive head ----
    # Single similarity matmul.  Valid shortcut because (a) world_size == 1 and
    # (b) targets is symmetric (idx equality is an equivalence relation => equal
    # positive-group sizes), hence sim_t2i == sim_i2t.T and the t2i term is the
    # column-wise log-softmax of the same matrix.
    # TODO(synk): the tiled all-gathered version must hold text tiles as (E, N)
    #             to avoid a per-tile XLU transpose and stream a column-LSE.
    inv_temp = inv_temp_ref[0]
    sim = lax.dot_general(v.astype(bf16), t.astype(bf16),
                          (((1,), (1,)), ((), ())),
                          preferred_element_type=f32) * inv_temp        # (B, B)

    pos = (idx_col_ref[...] == idx_row_ref[...]).astype(f32)            # (B, B) symmetric
    targets = pos / jnp.sum(pos, axis=1, keepdims=True)

    # Row-wise and column-wise log-sum-exp of the single sim matrix.
    m_r = jnp.max(sim, axis=1, keepdims=True)
    lse_r = jnp.log(jnp.sum(jnp.exp(sim - m_r), axis=1, keepdims=True)) + m_r
    m_c = jnp.max(sim, axis=0, keepdims=True)
    lse_c = jnp.log(jnp.sum(jnp.exp(sim - m_c), axis=0, keepdims=True)) + m_c

    # Fused i2t + t2i cross-entropy: one elementwise pass, one reduction.
    loss_ref[0, 0] = (-f32(0.5) / f32(B)) * jnp.sum(
        targets * (f32(2.0) * sim - lse_r - lse_c))


# ---------------------------------------------------------------------------
# Module forward: all downstream-of-encoder compute in ONE pallas_call.
# ---------------------------------------------------------------------------
def retrieval_forward(params, image_query, text_last_hidden, attention_mask, idx):
    B, S, Dt = text_last_hidden.shape
    Dv = image_query.shape[1]
    E = params["w_vision_proj"].shape[1]
    f32, bf16 = jnp.float32, jnp.bfloat16

    # Precision / layout plumbing only (no compute hoisted out of the kernel):
    # bf16 MXU operands halve weight/activation DMA bytes; accumulation stays f32.
    img_bf = image_query.astype(bf16)
    wv_bf = params["w_vision_proj"].astype(bf16)
    wt_bf = params["w_text_proj"].astype(bf16)
    bv = params["b_vision_proj"].reshape(1, E).astype(f32)
    bt = params["b_text_proj"].reshape(1, E).astype(f32)
    last_pos = (jnp.sum(attention_mask.astype(jnp.int32), axis=-1) - 1).astype(jnp.int32)
    idx_col = idx.reshape(B, 1).astype(jnp.int32)
    idx_row = idx.reshape(1, B).astype(jnp.int32)
    inv_temp = (jnp.float32(1.0) / params["temp"]).astype(f32).reshape(1)

    smem = pltpu.MemorySpace.SMEM

    cost = pl.CostEstimate(
        flops=2 * B * (Dv * E + Dt * E + B * E),
        transcendentals=2 * B * B + 6 * B,
        bytes_accessed=(B * Dv * 2 + Dv * E * 2 + Dt * E * 2 + 2 * E * 4
                        + B * Dt * 4 + 2 * B * 4 + B * 4 + 4 + 4),
    )

    loss = pl.pallas_call(
        retrieval_head_kernel,
        out_shape=jax.ShapeDtypeStruct((1, 1), jnp.float32),
        grid=(1,),
        in_specs=[
            pl.BlockSpec(memory_space=smem),              # last_pos (B,) i32
            pl.BlockSpec((B, Dv), lambda i: (0, 0)),      # image_query bf16
            pl.BlockSpec((Dv, E), lambda i: (0, 0)),      # w_vision_proj bf16
            pl.BlockSpec((1, E), lambda i: (0, 0)),       # b_vision_proj f32
            pl.BlockSpec(memory_space=pl.ANY),            # text_last_hidden stays in HBM
            pl.BlockSpec((Dt, E), lambda i: (0, 0)),      # w_text_proj bf16
            pl.BlockSpec((1, E), lambda i: (0, 0)),       # b_text_proj f32
            pl.BlockSpec((B, 1), lambda i: (0, 0)),       # idx (column)
            pl.BlockSpec((1, B), lambda i: (0, 0)),       # idx (row)
            pl.BlockSpec(memory_space=smem),              # inv_temp scalar
        ],
        out_specs=pl.BlockSpec(memory_space=smem),        # scalar loss -> SMEM
        scratch_shapes=[pltpu.VMEM((B, Dt), jnp.float32),       # pooled rows
                        pltpu.SemaphoreType.DMA((B,))],         # gather sems
        compiler_params=pltpu.CompilerParams(
            dimension_semantics=("arbitrary",)),
        cost_estimate=cost,
    )(
        last_pos, img_bf, wv_bf, bv,
        text_last_hidden, wt_bf, bt,
        idx_col, idx_row, inv_temp,
    )
    return loss[0, 0]


# ---------------------------------------------------------------------------
# Pure-JAX reference mirroring the PyTorch forward (same math structure,
# including the explicit sim_t2i matmul), run at the kernel's mixed precision
# (bf16 matmul operands, f32 accumulation) so the check is tight.
# ---------------------------------------------------------------------------
def retrieval_forward_ref(params, image_query, text_last_hidden, attention_mask, idx):
    f32, bf16 = jnp.float32, jnp.bfloat16

    def l2n(x):
        return x / jnp.maximum(jnp.linalg.norm(x, axis=-1, keepdims=True), 1e-12)

    def mm(a, b):   # matches kernel: bf16 operands, f32 accumulation on the MXU
        return jnp.dot(a.astype(bf16), b.astype(bf16), preferred_element_type=f32)

    v = l2n(mm(image_query, params["w_vision_proj"]) + params["b_vision_proj"])
    last_pos = jnp.sum(attention_mask, axis=-1) - 1
    pooled = jnp.take_along_axis(text_last_hidden, last_pos[:, None, None], axis=1)[:, 0, :]
    t = l2n(mm(pooled, params["w_text_proj"]) + params["b_text_proj"])

    sim_i2t = mm(v, t.T) / params["temp"]
    sim_t2i = mm(t, v.T) / params["temp"]
    pos = (idx[:, None] == idx[None, :]).astype(f32)
    targets = pos / pos.sum(1, keepdims=True)
    li2t = -jnp.sum(jax.nn.log_softmax(sim_i2t, axis=1) * targets, axis=1).mean()
    lt2i = -jnp.sum(jax.nn.log_softmax(sim_t2i, axis=1) * targets, axis=1).mean()
    return 0.5 * (li2t + lt2i)


if __name__ == "__main__":
    # Small shapes consistent with the module's head:
    B = 8                 # batch
    S = 16                # text sequence length
    VISION_WIDTH = 128    # visual_cfg['embed_dim']
    TEXT_WIDTH = 256      # text_cfg.hidden_size
    EMBED_DIM = 128       # contrastive_embed_dim

    key = jax.random.PRNGKey(0)
    k1, k2, k3, k4, k5 = jax.random.split(key, 5)

    # Deterministic "trunc_normal_(std=0.015)"-style parameter init.
    params = {
        "w_vision_proj": 0.015 * jax.random.normal(k1, (VISION_WIDTH, EMBED_DIM), jnp.float32),
        "b_vision_proj": jnp.zeros((EMBED_DIM,), jnp.float32),
        "w_text_proj": 0.015 * jax.random.normal(k2, (TEXT_WIDTH, EMBED_DIM), jnp.float32),
        "b_text_proj": jnp.zeros((EMBED_DIM,), jnp.float32),
        "temp": jnp.float32(0.07),
    }

    # Synthetic encoder outputs (stand-ins for TimeSformer / GPT3 backbones).
    image_query = jax.random.normal(k3, (B, VISION_WIDTH), jnp.float32)
    text_last_hidden = jax.random.normal(k4, (B, S, TEXT_WIDTH), jnp.float32)
    lengths = 1 + jax.random.randint(k5, (B,), 0, S)             # at least 1 valid token
    attention_mask = (jnp.arange(S)[None, :] < lengths[:, None]).astype(jnp.int32)
    # idx with some duplicates so pos_idx rows have multiple positives.
    idx = jnp.array([0, 1, 2, 0, 3, 1, 4, 5], jnp.int32)

    loss = retrieval_forward(params, image_query, text_last_hidden, attention_mask, idx)
    jax.block_until_ready(loss)

    loss_ref = retrieval_forward_ref(params, image_query, text_last_hidden, attention_mask, idx)
    # Tolerance covers bf16 operand-rounding boundary effects between the kernel's
    # in-VMEM f32->bf16 casts and the reference's; accumulation is f32 in both.
    assert jnp.allclose(loss, loss_ref, atol=2e-3, rtol=2e-3), (loss, loss_ref)

    print("KERNEL_OK")
</pallas_src>

<mosaic_0001>
module attributes {stable_mosaic.version = 11 : i64} {
  func.func @retrieval_head_kernel(%arg0: i32, %arg1: memref<8xi32, #tpu.memory_space<smem>>, %arg2: memref<8x128xbf16, #tpu.memory_space<vmem>>, %arg3: memref<128x128xbf16, #tpu.memory_space<vmem>>, %arg4: memref<1x128xf32, #tpu.memory_space<vmem>>, %arg5: memref<8x16x256xf32, #tpu.memory_space<any>>, %arg6: memref<256x128xbf16, #tpu.memory_space<vmem>>, %arg7: memref<1x128xf32, #tpu.memory_space<vmem>>, %arg8: memref<8x1xi32, #tpu.memory_space<vmem>>, %arg9: memref<1x8xi32, #tpu.memory_space<vmem>>, %arg10: memref<1xf32, #tpu.memory_space<smem>>, %arg11: memref<1x1xf32, #tpu.memory_space<smem>>, %arg12: memref<8x256xf32, #tpu.memory_space<vmem>>, %arg13: memref<8x!tpu.dma_semaphore, #tpu.memory_space<semaphore_mem>>) attributes {dimension_semantics = [#tpu.dimension_semantics<arbitrary>], iteration_bounds = array<i64: 1>, scalar_prefetch = 0 : i64, scratch_operands = 2 : i64, tpu.core_type = #tpu.core_type<tc>, window_params = [{transform_indices = @transform_0, window_bounds = array<i64: 8>}, {pipeline_mode = #tpu.pipeline_mode<synchronous>, transform_indices = @transform_1, window_bounds = array<i64: 8, 128>}, {pipeline_mode = #tpu.pipeline_mode<synchronous>, transform_indices = @transform_2, window_bounds = array<i64: 128, 128>}, {pipeline_mode = #tpu.pipeline_mode<synchronous>, transform_indices = @transform_3, window_bounds = array<i64: 1, 128>}, {}, {pipeline_mode = #tpu.pipeline_mode<synchronous>, transform_indices = @transform_5, window_bounds = array<i64: 256, 128>}, {pipeline_mode = #tpu.pipeline_mode<synchronous>, transform_indices = @transform_6, window_bounds = array<i64: 1, 128>}, {pipeline_mode = #tpu.pipeline_mode<synchronous>, transform_indices = @transform_7, window_bounds = array<i64: 8, 1>}, {pipeline_mode = #tpu.pipeline_mode<synchronous>, transform_indices = @transform_8, window_bounds = array<i64: 1, 8>}, {transform_indices = @transform_9, window_bounds = array<i64: 1>}, {transform_indices = @transform_10, window_bounds = array<i64: 1, 1>}]} {
    %c0 = arith.constant 0 : index
    %0 = memref.load %arg1[%c0] : memref<8xi32, #tpu.memory_space<smem>>
    %c0_i32 = arith.constant 0 : i32
    %c0_i32_0 = arith.constant 0 : i32
    %c0_i32_1 = arith.constant 0 : i32
    %1 = tpu.memref_slice %arg5[%c0_i32, %0, %c0_i32_1] : memref<8x16x256xf32, #tpu.memory_space<any>> -> memref<1x1x256xf32, #tpu.memory_space<any>>
    %2 = tpu.memref_squeeze %1 : memref<1x1x256xf32, #tpu.memory_space<any>> -> memref<1x256xf32, #tpu.memory_space<any>>
    %c0_i32_2 = arith.constant 0 : i32
    %c0_i32_3 = arith.constant 0 : i32
    %3 = tpu.memref_slice %arg12[%c0_i32_2, %c0_i32_3] : memref<8x256xf32, #tpu.memory_space<vmem>> -> memref<1x256xf32, #tpu.memory_space<vmem>>
    %4 = tpu.memref_slice %arg13[%c0_i32_0] : memref<8x!tpu.dma_semaphore, #tpu.memory_space<semaphore_mem>> -> memref<1x!tpu.dma_semaphore, #tpu.memory_space<semaphore_mem>>
    %5 = tpu.memref_squeeze %4 : memref<1x!tpu.dma_semaphore, #tpu.memory_space<semaphore_mem>> -> memref<!tpu.dma_semaphore, #tpu.memory_space<semaphore_mem>>
    tpu.enqueue_dma source(%2 : memref<1x256xf32, #tpu.memory_space<any>>) target(%3 : memref<1x256xf32, #tpu.memory_space<vmem>>) target_semaphore(%5 : memref<!tpu.dma_semaphore, #tpu.memory_space<semaphore_mem>>)
    %c1 = arith.constant 1 : index
    %6 = memref.load %arg1[%c1] : memref<8xi32, #tpu.memory_space<smem>>
    %c1_i32 = arith.constant 1 : i32
    %c1_i32_4 = arith.constant 1 : i32
    %c0_i32_5 = arith.constant 0 : i32
    %7 = tpu.memref_slice %arg5[%c1_i32, %6, %c0_i32_5] : memref<8x16x256xf32, #tpu.memory_space<any>> -> memref<1x1x256xf32, #tpu.memory_space<any>>
    %8 = tpu.memref_squeeze %7 : memref<1x1x256xf32, #tpu.memory_space<any>> -> memref<1x256xf32, #tpu.memory_space<any>>
    %c1_i32_6 = arith.constant 1 : i32
    %c0_i32_7 = arith.constant 0 : i32
    %9 = tpu.memref_slice %arg12[%c1_i32_6, %c0_i32_7] : memref<8x256xf32, #tpu.memory_space<vmem>> -> memref<1x256xf32, #tpu.memory_space<vmem>>
    %10 = tpu.memref_slice %arg13[%c1_i32_4] : memref<8x!tpu.dma_semaphore, #tpu.memory_space<semaphore_mem>> -> memref<1x!tpu.dma_semaphore, #tpu.memory_space<semaphore_mem>>
    %11 = tpu.memref_squeeze %10 : memref<1x!tpu.dma_semaphore, #tpu.memory_space<semaphore_mem>> -> memref<!tpu.dma_semaphore, #tpu.memory_space<semaphore_mem>>
    tpu.enqueue_dma source(%8 : memref<1x256xf32, #tpu.memory_space<any>>) target(%9 : memref<1x256xf32, #tpu.memory_space<vmem>>) target_semaphore(%11 : memref<!tpu.dma_semaphore, #tpu.memory_space<semaphore_mem>>)
    %c2 = arith.constant 2 : index
    %12 = memref.load %arg1[%c2] : memref<8xi32, #tpu.memory_space<smem>>
    %c2_i32 = arith.constant 2 : i32
    %c2_i32_8 = arith.constant 2 : i32
    %c0_i32_9 = arith.constant 0 : i32
    %13 = tpu.memref_slice %arg5[%c2_i32, %12, %c0_i32_9] : memref<8x16x256xf32, #tpu.memory_space<any>> -> memref<1x1x256xf32, #tpu.memory_space<any>>
    %14 = tpu.memref_squeeze %13 : memref<1x1x256xf32, #tpu.memory_space<any>> -> memref<1x256xf32, #tpu.memory_space<any>>
    %c2_i32_10 = arith.constant 2 : i32
    %c0_i32_11 = arith.constant 0 : i32
    %15 = tpu.memref_slice %arg12[%c2_i32_10, %c0_i32_11] : memref<8x256xf32, #tpu.memory_space<vmem>> -> memref<1x256xf32, #tpu.memory_space<vmem>>
    %16 = tpu.memref_slice %arg13[%c2_i32_8] : memref<8x!tpu.dma_semaphore, #tpu.memory_space<semaphore_mem>> -> memref<1x!tpu.dma_semaphore, #tpu.memory_space<semaphore_mem>>
    %17 = tpu.memref_squeeze %16 : memref<1x!tpu.dma_semaphore, #tpu.memory_space<semaphore_mem>> -> memref<!tpu.dma_semaphore, #tpu.memory_space<semaphore_mem>>
    tpu.enqueue_dma source(%14 : memref<1x256xf32, #tpu.memory_space<any>>) target(%15 : memref<1x256xf32, #tpu.memory_space<vmem>>) target_semaphore(%17 : memref<!tpu.dma_semaphore, #tpu.memory_space<semaphore_mem>>)
    %c3 = arith.constant 3 : index
    %18 = memref.load %arg1[%c3] : memref<8xi32, #tpu.memory_space<smem>>
    %c3_i32 = arith.constant 3 : i32
    %c3_i32_12 = arith.constant 3 : i32
    %c0_i32_13 = arith.constant 0 : i32
    %19 = tpu.memref_slice %arg5[%c3_i32, %18, %c0_i32_13] : memref<8x16x256xf32, #tpu.memory_space<any>> -> memref<1x1x256xf32, #tpu.memory_space<any>>
    %20 = tpu.memref_squeeze %19 : memref<1x1x256xf32, #tpu.memory_space<any>> -> memref<1x256xf32, #tpu.memory_space<any>>
    %c3_i32_14 = arith.constant 3 : i32
    %c0_i32_15 = arith.constant 0 : i32
    %21 = tpu.memref_slice %arg12[%c3_i32_14, %c0_i32_15] : memref<8x256xf32, #tpu.memory_space<vmem>> -> memref<1x256xf32, #tpu.memory_space<vmem>>
    %22 = tpu.memref_slice %arg13[%c3_i32_12] : memref<8x!tpu.dma_semaphore, #tpu.memory_space<semaphore_mem>> -> memref<1x!tpu.dma_semaphore, #tpu.memory_space<semaphore_mem>>
    %23 = tpu.memref_squeeze %22 : memref<1x!tpu.dma_semaphore, #tpu.memory_space<semaphore_mem>> -> memref<!tpu.dma_semaphore, #tpu.memory_space<semaphore_mem>>
    tpu.enqueue_dma source(%20 : memref<1x256xf32, #tpu.memory_space<any>>) target(%21 : memref<1x256xf32, #tpu.memory_space<vmem>>) target_semaphore(%23 : memref<!tpu.dma_semaphore, #tpu.memory_space<semaphore_mem>>)
    %c4 = arith.constant 4 : index
    %24 = memref.load %arg1[%c4] : memref<8xi32, #tpu.memory_space<smem>>
    %c4_i32 = arith.constant 4 : i32
    %c4_i32_16 = arith.constant 4 : i32
    %c0_i32_17 = arith.constant 0 : i32
    %25 = tpu.memref_slice %arg5[%c4_i32, %24, %c0_i32_17] : memref<8x16x256xf32, #tpu.memory_space<any>> -> memref<1x1x256xf32, #tpu.memory_space<any>>
    %26 = tpu.memref_squeeze %25 : memref<1x1x256xf32, #tpu.memory_space<any>> -> memref<1x256xf32, #tpu.memory_space<any>>
    %c4_i32_18 = arith.constant 4 : i32
    %c0_i32_19 = arith.constant 0 : i32
    %27 = tpu.memref_slice %arg12[%c4_i32_18, %c0_i32_19] : memref<8x256xf32, #tpu.memory_space<vmem>> -> memref<1x256xf32, #tpu.memory_space<vmem>>
    %28 = tpu.memref_slice %arg13[%c4_i32_16] : memref<8x!tpu.dma_semaphore, #tpu.memory_space<semaphore_mem>> -> memref<1x!tpu.dma_semaphore, #tpu.memory_space<semaphore_mem>>
    %29 = tpu.memref_squeeze %28 : memref<1x!tpu.dma_semaphore, #tpu.memory_space<semaphore_mem>> -> memref<!tpu.dma_semaphore, #tpu.memory_space<semaphore_mem>>
    tpu.enqueue_dma source(%26 : memref<1x256xf32, #tpu.memory_space<any>>) target(%27 : memref<1x256xf32, #tpu.memory_space<vmem>>) target_semaphore(%29 : memref<!tpu.dma_semaphore, #tpu.memory_space<semaphore_mem>>)
    %c5 = arith.constant 5 : index
    %30 = memref.load %arg1[%c5] : memref<8xi32, #tpu.memory_space<smem>>
    %c5_i32 = arith.constant 5 : i32
    %c5_i32_20 = arith.constant 5 : i32
    %c0_i32_21 = arith.constant 0 : i32
    %31 = tpu.memref_slice %arg5[%c5_i32, %30, %c0_i32_21] : memref<8x16x256xf32, #tpu.memory_space<any>> -> memref<1x1x256xf32, #tpu.memory_space<any>>
    %32 = tpu.memref_squeeze %31 : memref<1x1x256xf32, #tpu.memory_space<any>> -> memref<1x256xf32, #tpu.memory_space<any>>
    %c5_i32_22 = arith.constant 5 : i32
    %c0_i32_23 = arith.constant 0 : i32
    %33 = tpu.memref_slice %arg12[%c5_i32_22, %c0_i32_23] : memref<8x256xf32, #tpu.memory_space<vmem>> -> memref<1x256xf32, #tpu.memory_space<vmem>>
    %34 = tpu.memref_slice %arg13[%c5_i32_20] : memref<8x!tpu.dma_semaphore, #tpu.memory_space<semaphore_mem>> -> memref<1x!tpu.dma_semaphore, #tpu.memory_space<semaphore_mem>>
    %35 = tpu.memref_squeeze %34 : memref<1x!tpu.dma_semaphore, #tpu.memory_space<semaphore_mem>> -> memref<!tpu.dma_semaphore, #tpu.memory_space<semaphore_mem>>
    tpu.enqueue_dma source(%32 : memref<1x256xf32, #tpu.memory_space<any>>) target(%33 : memref<1x256xf32, #tpu.memory_space<vmem>>) target_semaphore(%35 : memref<!tpu.dma_semaphore, #tpu.memory_space<semaphore_mem>>)
    %c6 = arith.constant 6 : index
    %36 = memref.load %arg1[%c6] : memref<8xi32, #tpu.memory_space<smem>>
    %c6_i32 = arith.constant 6 : i32
    %c6_i32_24 = arith.constant 6 : i32
    %c0_i32_25 = arith.constant 0 : i32
    %37 = tpu.memref_slice %arg5[%c6_i32, %36, %c0_i32_25] : memref<8x16x256xf32, #tpu.memory_space<any>> -> memref<1x1x256xf32, #tpu.memory_space<any>>
    %38 = tpu.memref_squeeze %37 : memref<1x1x256xf32, #tpu.memory_space<any>> -> memref<1x256xf32, #tpu.memory_space<any>>
    %c6_i32_26 = arith.constant 6 : i32
    %c0_i32_27 = arith.constant 0 : i32
    %39 = tpu.memref_slice %arg12[%c6_i32_26, %c0_i32_27] : memref<8x256xf32, #tpu.memory_space<vmem>> -> memref<1x256xf32, #tpu.memory_space<vmem>>
    %40 = tpu.memref_slice %arg13[%c6_i32_24] : memref<8x!tpu.dma_semaphore, #tpu.memory_space<semaphore_mem>> -> memref<1x!tpu.dma_semaphore, #tpu.memory_space<semaphore_mem>>
    %41 = tpu.memref_squeeze %40 : memref<1x!tpu.dma_semaphore, #tpu.memory_space<semaphore_mem>> -> memref<!tpu.dma_semaphore, #tpu.memory_space<semaphore_mem>>
    tpu.enqueue_dma source(%38 : memref<1x256xf32, #tpu.memory_space<any>>) target(%39 : memref<1x256xf32, #tpu.memory_space<vmem>>) target_semaphore(%41 : memref<!tpu.dma_semaphore, #tpu.memory_space<semaphore_mem>>)
    %c7 = arith.constant 7 : index
    %42 = memref.load %arg1[%c7] : memref<8xi32, #tpu.memory_space<smem>>
    %c7_i32 = arith.constant 7 : i32
    %c7_i32_28 = arith.constant 7 : i32
    %c0_i32_29 = arith.constant 0 : i32
    %43 = tpu.memref_slice %arg5[%c7_i32, %42, %c0_i32_29] : memref<8x16x256xf32, #tpu.memory_space<any>> -> memref<1x1x256xf32, #tpu.memory_space<any>>
    %44 = tpu.memref_squeeze %43 : memref<1x1x256xf32, #tpu.memory_space<any>> -> memref<1x256xf32, #tpu.memory_space<any>>
    %c7_i32_30 = arith.constant 7 : i32
    %c0_i32_31 = arith.constant 0 : i32
    %45 = tpu.memref_slice %arg12[%c7_i32_30, %c0_i32_31] : memref<8x256xf32, #tpu.memory_space<vmem>> -> memref<1x256xf32, #tpu.memory_space<vmem>>
    %46 = tpu.memref_slice %arg13[%c7_i32_28] : memref<8x!tpu.dma_semaphore, #tpu.memory_space<semaphore_mem>> -> memref<1x!tpu.dma_semaphore, #tpu.memory_space<semaphore_mem>>
    %47 = tpu.memref_squeeze %46 : memref<1x!tpu.dma_semaphore, #tpu.memory_space<semaphore_mem>> -> memref<!tpu.dma_semaphore, #tpu.memory_space<semaphore_mem>>
    tpu.enqueue_dma source(%44 : memref<1x256xf32, #tpu.memory_space<any>>) target(%45 : memref<1x256xf32, #tpu.memory_space<vmem>>) target_semaphore(%47 : memref<!tpu.dma_semaphore, #tpu.memory_space<semaphore_mem>>)
    %c0_32 = arith.constant 0 : index
    %c0_33 = arith.constant 0 : index
    %48 = vector.load %arg2[%c0_32, %c0_33] : memref<8x128xbf16, #tpu.memory_space<vmem>>, vector<8x128xbf16>
    %c0_34 = arith.constant 0 : index
    %c0_35 = arith.constant 0 : index
    %49 = vector.load %arg3[%c0_34, %c0_35] : memref<128x128xbf16, #tpu.memory_space<vmem>>, vector<128x128xbf16>
    %cst = arith.constant dense<0.000000e+00> : vector<8x128xf32>
    %50 = tpu.matmul %48, %49, %cst {dimension_numbers = #tpu.dot_dimension_numbers<[1], [0], [0], [1], [0, 0, 1, 1], [], []>} : vector<8x128xbf16>, vector<128x128xbf16>, vector<8x128xf32> -> vector<8x128xf32>
    %c0_36 = arith.constant 0 : index
    %c0_37 = arith.constant 0 : index
    %51 = vector.load %arg4[%c0_36, %c0_37] : memref<1x128xf32, #tpu.memory_space<vmem>>, vector<1x128xf32>
    %52 = vector.broadcast %51 : vector<1x128xf32> to vector<8x128xf32>
    %53 = arith.addf %50, %52 : vector<8x128xf32>
    %54 = arith.mulf %53, %53 : vector<8x128xf32>
    %cst_38 = arith.constant dense<0.000000e+00> : vector<8xf32>
    %55 = vector.multi_reduction <add>, %54, %cst_38 [1] : vector<8x128xf32> to vector<8xf32>
    %56 = vector.shape_cast %55 : vector<8xf32> to vector<8x1xf32>
    %cst_39 = arith.constant 1.000000e-24 : f32
    %57 = vector.broadcast %cst_39 : f32 to vector<8x1xf32>
    %58 = arith.maximumf %56, %57 : vector<8x1xf32>
    %59 = math.rsqrt %58 : vector<8x1xf32>
    %60 = vector.broadcast %59 : vector<8x1xf32> to vector<8x128xf32>
    %61 = arith.mulf %53, %60 : vector<8x128xf32>
    %c0_i32_40 = arith.constant 0 : i32
    %c0_i32_41 = arith.constant 0 : i32
    %c0_i32_42 = arith.constant 0 : i32
    %62 = tpu.memref_slice %arg5[%c0_i32_40, %0, %c0_i32_42] : memref<8x16x256xf32, #tpu.memory_space<any>> -> memref<1x1x256xf32, #tpu.memory_space<any>>
    %63 = tpu.memref_squeeze %62 : memref<1x1x256xf32, #tpu.memory_space<any>> -> memref<1x256xf32, #tpu.memory_space<any>>
    %c0_i32_43 = arith.constant 0 : i32
    %c0_i32_44 = arith.constant 0 : i32
    %64 = tpu.memref_slice %arg12[%c0_i32_43, %c0_i32_44] : memref<8x256xf32, #tpu.memory_space<vmem>> -> memref<1x256xf32, #tpu.memory_space<vmem>>
    %65 = tpu.memref_slice %arg13[%c0_i32_41] : memref<8x!tpu.dma_semaphore, #tpu.memory_space<semaphore_mem>> -> memref<1x!tpu.dma_semaphore, #tpu.memory_space<semaphore_mem>>
    %66 = tpu.memref_squeeze %65 : memref<1x!tpu.dma_semaphore, #tpu.memory_space<semaphore_mem>> -> memref<!tpu.dma_semaphore, #tpu.memory_space<semaphore_mem>>
    tpu.wait_dma2 semaphore(%66 : memref<!tpu.dma_semaphore, #tpu.memory_space<semaphore_mem>>) src(%63 : memref<1x256xf32, #tpu.memory_space<any>>) dst(%64 : memref<1x256xf32, #tpu.memory_space<vmem>>)
    %c1_i32_45 = arith.constant 1 : i32
    %c1_i32_46 = arith.constant 1 : i32
    %c0_i32_47 = arith.constant 0 : i32
    %67 = tpu.memref_slice %arg5[%c1_i32_45, %6, %c0_i32_47] : memref<8x16x256xf32, #tpu.memory_space<any>> -> memref<1x1x256xf32, #tpu.memory_space<any>>
    %68 = tpu.memref_squeeze %67 : memref<1x1x256xf32, #tpu.memory_space<any>> -> memref<1x256xf32, #tpu.memory_space<any>>
    %c1_i32_48 = arith.constant 1 : i32
    %c0_i32_49 = arith.constant 0 : i32
    %69 = tpu.memref_slice %arg12[%c1_i32_48, %c0_i32_49] : memref<8x256xf32, #tpu.memory_space<vmem>> -> memref<1x256xf32, #tpu.memory_space<vmem>>
    %70 = tpu.memref_slice %arg13[%c1_i32_46] : memref<8x!tpu.dma_semaphore, #tpu.memory_space<semaphore_mem>> -> memref<1x!tpu.dma_semaphore, #tpu.memory_space<semaphore_mem>>
    %71 = tpu.memref_squeeze %70 : memref<1x!tpu.dma_semaphore, #tpu.memory_space<semaphore_mem>> -> memref<!tpu.dma_semaphore, #tpu.memory_space<semaphore_mem>>
    tpu.wait_dma2 semaphore(%71 : memref<!tpu.dma_semaphore, #tpu.memory_space<semaphore_mem>>) src(%68 : memref<1x256xf32, #tpu.memory_space<any>>) dst(%69 : memref<1x256xf32, #tpu.memory_space<vmem>>)
    %c2_i32_50 = arith.constant 2 : i32
    %c2_i32_51 = arith.constant 2 : i32
    %c0_i32_52 = arith.constant 0 : i32
    %72 = tpu.memref_slice %arg5[%c2_i32_50, %12, %c0_i32_52] : memref<8x16x256xf32, #tpu.memory_space<any>> -> memref<1x1x256xf32, #tpu.memory_space<any>>
    %73 = tpu.memref_squeeze %72 : memref<1x1x256xf32, #tpu.memory_space<any>> -> memref<1x256xf32, #tpu.memory_space<any>>
    %c2_i32_53 = arith.constant 2 : i32
    %c0_i32_54 = arith.constant 0 : i32
    %74 = tpu.memref_slice %arg12[%c2_i32_53, %c0_i32_54] : memref<8x256xf32, #tpu.memory_space<vmem>> -> memref<1x256xf32, #tpu.memory_space<vmem>>
    %75 = tpu.memref_slice %arg13[%c2_i32_51] : memref<8x!tpu.dma_semaphore, #tpu.memory_space<semaphore_mem>> -> memref<1x!tpu.dma_semaphore, #tpu.memory_space<semaphore_mem>>
    %76 = tpu.memref_squeeze %75 : memref<1x!tpu.dma_semaphore, #tpu.memory_space<semaphore_mem>> -> memref<!tpu.dma_semaphore, #tpu.memory_space<semaphore_mem>>
    tpu.wait_dma2 semaphore(%76 : memref<!tpu.dma_semaphore, #tpu.memory_space<semaphore_mem>>) src(%73 : memref<1x256xf32, #tpu.memory_space<any>>) dst(%74 : memref<1x256xf32, #tpu.memory_space<vmem>>)
    %c3_i32_55 = arith.constant 3 : i32
    %c3_i32_56 = arith.constant 3 : i32
    %c0_i32_57 = arith.constant 0 : i32
    %77 = tpu.memref_slice %arg5[%c3_i32_55, %18, %c0_i32_57] : memref<8x16x256xf32, #tpu.memory_space<any>> -> memref<1x1x256xf32, #tpu.memory_space<any>>
    %78 = tpu.memref_squeeze %77 : memref<1x1x256xf32, #tpu.memory_space<any>> -> memref<1x256xf32, #tpu.memory_space<any>>
    %c3_i32_58 = arith.constant 3 : i32
    %c0_i32_59 = arith.constant 0 : i32
    %79 = tpu.memref_slice %arg12[%c3_i32_58, %c0_i32_59] : memref<8x256xf32, #tpu.memory_space<vmem>> -> memref<1x256xf32, #tpu.memory_space<vmem>>
    %80 = tpu.memref_slice %arg13[%c3_i32_56] : memref<8x!tpu.dma_semaphore, #tpu.memory_space<semaphore_mem>> -> memref<1x!tpu.dma_semaphore, #tpu.memory_space<semaphore_mem>>
    %81 = tpu.memref_squeeze %80 : memref<1x!tpu.dma_semaphore, #tpu.memory_space<semaphore_mem>> -> memref<!tpu.dma_semaphore, #tpu.memory_space<semaphore_mem>>
    tpu.wait_dma2 semaphore(%81 : memref<!tpu.dma_semaphore, #tpu.memory_space<semaphore_mem>>) src(%78 : memref<1x256xf32, #tpu.memory_space<any>>) dst(%79 : memref<1x256xf32, #tpu.memory_space<vmem>>)
    %c4_i32_60 = arith.constant 4 : i32
    %c4_i32_61 = arith.constant 4 : i32
    %c0_i32_62 = arith.constant 0 : i32
    %82 = tpu.memref_slice %arg5[%c4_i32_60, %24, %c0_i32_62] : memref<8x16x256xf32, #tpu.memory_space<any>> -> memref<1x1x256xf32, #tpu.memory_space<any>>
    %83 = tpu.memref_squeeze %82 : memref<1x1x256xf32, #tpu.memory_space<any>> -> memref<1x256xf32, #tpu.memory_space<any>>
    %c4_i32_63 = arith.constant 4 : i32
    %c0_i32_64 = arith.constant 0 : i32
    %84 = tpu.memref_slice %arg12[%c4_i32_63, %c0_i32_64] : memref<8x256xf32, #tpu.memory_space<vmem>> -> memref<1x256xf32, #tpu.memory_space<vmem>>
    %85 = tpu.memref_slice %arg13[%c4_i32_61] : memref<8x!tpu.dma_semaphore, #tpu.memory_space<semaphore_mem>> -> memref<1x!tpu.dma_semaphore, #tpu.memory_space<semaphore_mem>>
    %86 = tpu.memref_squeeze %85 : memref<1x!tpu.dma_semaphore, #tpu.memory_space<semaphore_mem>> -> memref<!tpu.dma_semaphore, #tpu.memory_space<semaphore_mem>>
    tpu.wait_dma2 semaphore(%86 : memref<!tpu.dma_semaphore, #tpu.memory_space<semaphore_mem>>) src(%83 : memref<1x256xf32, #tpu.memory_space<any>>) dst(%84 : memref<1x256xf32, #tpu.memory_space<vmem>>)
    %c5_i32_65 = arith.constant 5 : i32
    %c5_i32_66 = arith.constant 5 : i32
    %c0_i32_67 = arith.constant 0 : i32
    %87 = tpu.memref_slice %arg5[%c5_i32_65, %30, %c0_i32_67] : memref<8x16x256xf32, #tpu.memory_space<any>> -> memref<1x1x256xf32, #tpu.memory_space<any>>
    %88 = tpu.memref_squeeze %87 : memref<1x1x256xf32, #tpu.memory_space<any>> -> memref<1x256xf32, #tpu.memory_space<any>>
    %c5_i32_68 = arith.constant 5 : i32
    %c0_i32_69 = arith.constant 0 : i32
    %89 = tpu.memref_slice %arg12[%c5_i32_68, %c0_i32_69] : memref<8x256xf32, #tpu.memory_space<vmem>> -> memref<1x256xf32, #tpu.memory_space<vmem>>
    %90 = tpu.memref_slice %arg13[%c5_i32_66] : memref<8x!tpu.dma_semaphore, #tpu.memory_space<semaphore_mem>> -> memref<1x!tpu.dma_semaphore, #tpu.memory_space<semaphore_mem>>
    %91 = tpu.memref_squeeze %90 : memref<1x!tpu.dma_semaphore, #tpu.memory_space<semaphore_mem>> -> memref<!tpu.dma_semaphore, #tpu.memory_space<semaphore_mem>>
    tpu.wait_dma2 semaphore(%91 : memref<!tpu.dma_semaphore, #tpu.memory_space<semaphore_mem>>) src(%88 : memref<1x256xf32, #tpu.memory_space<any>>) dst(%89 : memref<1x256xf32, #tpu.memory_space<vmem>>)
    %c6_i32_70 = arith.constant 6 : i32
    %c6_i32_71 = arith.constant 6 : i32
    %c0_i32_72 = arith.constant 0 : i32
    %92 = tpu.memref_slice %arg5[%c6_i32_70, %36, %c0_i32_72] : memref<8x16x256xf32, #tpu.memory_space<any>> -> memref<1x1x256xf32, #tpu.memory_space<any>>
    %93 = tpu.memref_squeeze %92 : memref<1x1x256xf32, #tpu.memory_space<any>> -> memref<1x256xf32, #tpu.memory_space<any>>
    %c6_i32_73 = arith.constant 6 : i32
    %c0_i32_74 = arith.constant 0 : i32
    %94 = tpu.memref_slice %arg12[%c6_i32_73, %c0_i32_74] : memref<8x256xf32, #tpu.memory_space<vmem>> -> memref<1x256xf32, #tpu.memory_space<vmem>>
    %95 = tpu.memref_slice %arg13[%c6_i32_71] : memref<8x!tpu.dma_semaphore, #tpu.memory_space<semaphore_mem>> -> memref<1x!tpu.dma_semaphore, #tpu.memory_space<semaphore_mem>>
    %96 = tpu.memref_squeeze %95 : memref<1x!tpu.dma_semaphore, #tpu.memory_space<semaphore_mem>> -> memref<!tpu.dma_semaphore, #tpu.memory_space<semaphore_mem>>
    tpu.wait_dma2 semaphore(%96 : memref<!tpu.dma_semaphore, #tpu.memory_space<semaphore_mem>>) src(%93 : memref<1x256xf32, #tpu.memory_space<any>>) dst(%94 : memref<1x256xf32, #tpu.memory_space<vmem>>)
    %c7_i32_75 = arith.constant 7 : i32
    %c7_i32_76 = arith.constant 7 : i32
    %c0_i32_77 = arith.constant 0 : i32
    %97 = tpu.memref_slice %arg5[%c7_i32_75, %42, %c0_i32_77] : memref<8x16x256xf32, #tpu.memory_space<any>> -> memref<1x1x256xf32, #tpu.memory_space<any>>
    %98 = tpu.memref_squeeze %97 : memref<1x1x256xf32, #tpu.memory_space<any>> -> memref<1x256xf32, #tpu.memory_space<any>>
    %c7_i32_78 = arith.constant 7 : i32
    %c0_i32_79 = arith.constant 0 : i32
    %99 = tpu.memref_slice %arg12[%c7_i32_78, %c0_i32_79] : memref<8x256xf32, #tpu.memory_space<vmem>> -> memref<1x256xf32, #tpu.memory_space<vmem>>
    %100 = tpu.memref_slice %arg13[%c7_i32_76] : memref<8x!tpu.dma_semaphore, #tpu.memory_space<semaphore_mem>> -> memref<1x!tpu.dma_semaphore, #tpu.memory_space<semaphore_mem>>
    %101 = tpu.memref_squeeze %100 : memref<1x!tpu.dma_semaphore, #tpu.memory_space<semaphore_mem>> -> memref<!tpu.dma_semaphore, #tpu.memory_space<semaphore_mem>>
    tpu.wait_dma2 semaphore(%101 : memref<!tpu.dma_semaphore, #tpu.memory_space<semaphore_mem>>) src(%98 : memref<1x256xf32, #tpu.memory_space<any>>) dst(%99 : memref<1x256xf32, #tpu.memory_space<vmem>>)
    %c0_80 = arith.constant 0 : index
    %c0_81 = arith.constant 0 : index
    %102 = vector.load %arg12[%c0_80, %c0_81] : memref<8x256xf32, #tpu.memory_space<vmem>>, vector<8x256xf32>
    %103 = arith.truncf %102 : vector<8x256xf32> to vector<8x256xbf16>
    %c0_82 = arith.constant 0 : index
    %c0_83 = arith.constant 0 : index
    %104 = vector.load %arg6[%c0_82, %c0_83] : memref<256x128xbf16, #tpu.memory_space<vmem>>, vector<256x128xbf16>
    %cst_84 = arith.constant dense<0.000000e+00> : vector<8x128xf32>
    %105 = tpu.matmul %103, %104, %cst_84 {dimension_numbers = #tpu.dot_dimension_numbers<[1], [0], [0], [1], [0, 0, 1, 1], [], []>} : vector<8x256xbf16>, vector<256x128xbf16>, vector<8x128xf32> -> vector<8x128xf32>
    %c0_85 = arith.constant 0 : index
    %c0_86 = arith.constant 0 : index
    %106 = vector.load %arg7[%c0_85, %c0_86] : memref<1x128xf32, #tpu.memory_space<vmem>>, vector<1x128xf32>
    %107 = vector.broadcast %106 : vector<1x128xf32> to vector<8x128xf32>
    %108 = arith.addf %105, %107 : vector<8x128xf32>
    %109 = arith.mulf %108, %108 : vector<8x128xf32>
    %cst_87 = arith.constant dense<0.000000e+00> : vector<8xf32>
    %110 = vector.multi_reduction <add>, %109, %cst_87 [1] : vector<8x128xf32> to vector<8xf32>
    %111 = vector.shape_cast %110 : vector<8xf32> to vector<8x1xf32>
    %cst_88 = arith.constant 1.000000e-24 : f32
    %112 = vector.broadcast %cst_88 : f32 to vector<8x1xf32>
    %113 = arith.maximumf %111, %112 : vector<8x1xf32>
    %114 = math.rsqrt %113 : vector<8x1xf32>
    %115 = vector.broadcast %114 : vector<8x1xf32> to vector<8x128xf32>
    %116 = arith.mulf %108, %115 : vector<8x128xf32>
    %c0_89 = arith.constant 0 : index
    %117 = memref.load %arg10[%c0_89] : memref<1xf32, #tpu.memory_space<smem>>
    %118 = arith.truncf %61 : vector<8x128xf32> to vector<8x128xbf16>
    %119 = arith.truncf %116 : vector<8x128xf32> to vector<8x128xbf16>
    %cst_90 = arith.constant dense<0.000000e+00> : vector<8x8xf32>
    %120 = tpu.matmul %118, %119, %cst_90 {dimension_numbers = #tpu.dot_dimension_numbers<[1], [1], [0], [0], [0, 0, 1, 0], [], []>} : vector<8x128xbf16>, vector<8x128xbf16>, vector<8x8xf32> -> vector<8x8xf32>
    %121 = vector.broadcast %117 : f32 to vector<8x8xf32>
    %122 = arith.mulf %120, %121 : vector<8x8xf32>
    %c0_91 = arith.constant 0 : index
    %c0_92 = arith.constant 0 : index
    %123 = vector.load %arg8[%c0_91, %c0_92] : memref<8x1xi32, #tpu.memory_space<vmem>>, vector<8x1xi32>
    %c0_93 = arith.constant 0 : index
    %c0_94 = arith.constant 0 : index
    %124 = vector.load %arg9[%c0_93, %c0_94] : memref<1x8xi32, #tpu.memory_space<vmem>>, vector<1x8xi32>
    %125 = vector.broadcast %123 : vector<8x1xi32> to vector<8x8xi32>
    %126 = vector.broadcast %124 : vector<1x8xi32> to vector<8x8xi32>
    %127 = arith.cmpi eq, %125, %126 : vector<8x8xi32>
    %128 = arith.extui %127 : vector<8x8xi1> to vector<8x8xi32>
    %129 = arith.sitofp %128 : vector<8x8xi32> to vector<8x8xf32>
    %cst_95 = arith.constant dense<0.000000e+00> : vector<8xf32>
    %130 = vector.multi_reduction <add>, %129, %cst_95 [1] : vector<8x8xf32> to vector<8xf32>
    %131 = vector.shape_cast %130 : vector<8xf32> to vector<8x1xf32>
    %132 = vector.broadcast %131 : vector<8x1xf32> to vector<8x8xf32>
    %133 = arith.divf %129, %132 : vector<8x8xf32>
    %cst_96 = arith.constant dense<0xFF800000> : vector<8xf32>
    %134 = vector.multi_reduction <maximumf>, %122, %cst_96 [1] : vector<8x8xf32> to vector<8xf32>
    %135 = vector.shape_cast %134 : vector<8xf32> to vector<8x1xf32>
    %136 = vector.broadcast %135 : vector<8x1xf32> to vector<8x8xf32>
    %137 = arith.subf %122, %136 : vector<8x8xf32>
    %138 = math.exp %137 : vector<8x8xf32>
    %cst_97 = arith.constant dense<0.000000e+00> : vector<8xf32>
    %139 = vector.multi_reduction <add>, %138, %cst_97 [1] : vector<8x8xf32> to vector<8xf32>
    %140 = vector.shape_cast %139 : vector<8xf32> to vector<8x1xf32>
    %141 = math.log %140 : vector<8x1xf32>
    %142 = arith.addf %141, %135 : vector<8x1xf32>
    %cst_98 = arith.constant dense<0xFF800000> : vector<8xf32>
    %143 = vector.multi_reduction <maximumf>, %122, %cst_98 [0] : vector<8x8xf32> to vector<8xf32>
    %144 = vector.shape_cast %143 : vector<8xf32> to vector<1x8xf32>
    %145 = vector.broadcast %144 : vector<1x8xf32> to vector<8x8xf32>
    %146 = arith.subf %122, %145 : vector<8x8xf32>
    %147 = math.exp %146 : vector<8x8xf32>
    %cst_99 = arith.constant dense<0.000000e+00> : vector<8xf32>
    %148 = vector.multi_reduction <add>, %147, %cst_99 [0] : vector<8x8xf32> to vector<8xf32>
    %149 = vector.shape_cast %148 : vector<8xf32> to vector<1x8xf32>
    %150 = math.log %149 : vector<1x8xf32>
    %151 = arith.addf %150, %144 : vector<1x8xf32>
    %cst_100 = arith.constant 0.000000e+00 : f32
    %cst_101 = arith.constant 5.000000e-01 : f32
    %152 = arith.subf %cst_100, %cst_101 : f32
    %cst_102 = arith.constant 8.000000e+00 : f32
    %153 = arith.divf %152, %cst_102 : f32
    %cst_103 = arith.constant 2.000000e+00 : f32
    %154 = vector.broadcast %cst_103 : f32 to vector<8x8xf32>
    %155 = arith.mulf %154, %122 : vector<8x8xf32>
    %156 = vector.broadcast %142 : vector<8x1xf32> to vector<8x8xf32>
    %157 = arith.subf %155, %156 : vector<8x8xf32>
    %158 = vector.broadcast %151 : vector<1x8xf32> to vector<8x8xf32>
    %159 = arith.subf %157, %158 : vector<8x8xf32>
    %160 = arith.mulf %133, %159 : vector<8x8xf32>
    %161 = vector.shape_cast %160 : vector<8x8xf32> to vector<1x8x8xf32>
    %cst_104 = arith.constant dense<0.000000e+00> : vector<1xf32>
    %162 = vector.multi_reduction <add>, %161, %cst_104 [1, 2] : vector<1x8x8xf32> to vector<1xf32>
    %163 = vector.shape_cast %162 : vector<1xf32> to vector<1x1x1xf32>
    %164 = vector.extract %163[0, 0, 0] : f32 from vector<1x1x1xf32>
    %165 = arith.mulf %153, %164 : f32
    %c0_105 = arith.constant 0 : index
    %c0_106 = arith.constant 0 : index
    %166 = memref.load %arg11[%c0_105, %c0_106] : memref<1x1xf32, #tpu.memory_space<smem>>
    memref.store %165, %arg11[%c0_105, %c0_106] : memref<1x1xf32, #tpu.memory_space<smem>>
    return
  }
  func.func @transform_0(%arg0: i32) -> i32 {
    %c0_i32 = arith.constant 0 : i32
    %c0_i32_0 = arith.constant 0 : i32
    return %c0_i32 : i32
  }
  func.func @transform_1(%arg0: i32) -> (i32, i32) {
    %c0_i32 = arith.constant 0 : i32
    %c0_i32_0 = arith.constant 0 : i32
    %c0_i32_1 = arith.constant 0 : i32
    return %c0_i32, %c0_i32_0 : i32, i32
  }
  func.func @transform_2(%arg0: i32) -> (i32, i32) {
    %c0_i32 = arith.constant 0 : i32
    %c0_i32_0 = arith.constant 0 : i32
    %c0_i32_1 = arith.constant 0 : i32
    return %c0_i32, %c0_i32_0 : i32, i32
  }
  func.func @transform_3(%arg0: i32) -> (i32, i32) {
    %c0_i32 = arith.constant 0 : i32
    %c0_i32_0 = arith.constant 0 : i32
    %c0_i32_1 = arith.constant 0 : i32
    return %c0_i32, %c0_i32_0 : i32, i32
  }
  func.func @transform_5(%arg0: i32) -> (i32, i32) {
    %c0_i32 = arith.constant 0 : i32
    %c0_i32_0 = arith.constant 0 : i32
    %c0_i32_1 = arith.constant 0 : i32
    return %c0_i32, %c0_i32_0 : i32, i32
  }
  func.func @transform_6(%arg0: i32) -> (i32, i32) {
    %c0_i32 = arith.constant 0 : i32
    %c0_i32_0 = arith.constant 0 : i32
    %c0_i32_1 = arith.constant 0 : i32
    return %c0_i32, %c0_i32_0 : i32, i32
  }
  func.func @transform_7(%arg0: i32) -> (i32, i32) {
    %c0_i32 = arith.constant 0 : i32
    %c0_i32_0 = arith.constant 0 : i32
    %c0_i32_1 = arith.constant 0 : i32
    return %c0_i32, %c0_i32_0 : i32, i32
  }
  func.func @transform_8(%arg0: i32) -> (i32, i32) {
    %c0_i32 = arith.constant 0 : i32
    %c0_i32_0 = arith.constant 0 : i32
    %c0_i32_1 = arith.constant 0 : i32
    return %c0_i32, %c0_i32_0 : i32, i32
  }
  func.func @transform_9(%arg0: i32) -> i32 {
    %c0_i32 = arith.constant 0 : i32
    %c0_i32_0 = arith.constant 0 : i32
    return %c0_i32 : i32
  }
  func.func @transform_10(%arg0: i32) -> (i32, i32) {
    %c0_i32 = arith.constant 0 : i32
    %c0_i32_0 = arith.constant 0 : i32
    %c0_i32_1 = arith.constant 0 : i32
    return %c0_i32, %c0_i32_0 : i32, i32
  }
}

</mosaic_0001>

<bundles_post_ra>
// kernel: tpu_custom_call.1
= control target key start
LH: loop header
LB: loop body
LE: loop exit
PB: predicated region body
PF: predicated region fallthrough
CT: control target
= control target key end

     0   :  { %s1447_s0 = inlined_call_operand.vmem [shape: s32[8], index: 0, kind: input, shape index: {}]   ;;  %s1448_s1 = inlined_call_operand.vmem [shape: bf16[8,128], index: 1, kind: input, shape index: {}]   ;;  %s1449_s2 = inlined_call_operand.hbm [shape: bf16[128,128], index: 2, kind: input, shape index: {}]   ;;  %s1450_s3 = inlined_call_operand.vmem [shape: f32[1,128], index: 3, kind: input, shape index: {}]   ;;  %s1451_s4 = inlined_call_operand.hbm [shape: f32[8,16,256], index: 4, kind: input, shape index: {}]   ;;  %s1452_s5 = inlined_call_operand.hbm [shape: bf16[256,128], index: 5, kind: input, shape index: {}]   ;;  %s1453_s6 = inlined_call_operand.vmem [shape: f32[1,128], index: 6, kind: input, shape index: {}]   ;;  %s1454_s7 = inlined_call_operand.vmem [shape: s32[8,1], index: 7, kind: input, shape index: {}]   ;;  %s1455_s8 = inlined_call_operand.vmem [shape: s32[1,8], index: 8, kind: input, shape index: {}]   ;;  %s1456_s9 = inlined_call_operand.<no memory space> [shape: f32[1], index: 9, kind: input, shape index: {}]   ;;  %s1457_s10 = inlined_call_operand.hbm [shape: f32[1,1], index: 10, kind: output, shape index: {}]  }
   0x1   :  { %1458 = sst [smem:[#allocation33_spill]] %s1456_s9 }
   0x2   :  { %1459 = sst [smem:[#allocation34_spill]] %s1457_s10 }
   0x3   :  { %16 = vsyncpa [#allocation8], 0 }
   0x4   :  { %17 = vsyncpa [#allocation6], 0 }
   0x5   :  { %18 = vsyncpa [#allocation11], 0 }
   0x6   :  { %19 = vsyncpa [#allocation7], 0  ;;  %s26_s15 = sshll.u32 %s1447_s0, 4  ;;  %s27_s15 = int_to_ptr.vmem [resolvable:$true] %s26_s15 }
   0x7   :  { %s914_s16 = scalar_lea.vmem %s27_s15, 16  ;;  %p919_p1 = scmp.lt.s32.totalorder %s27_s15, %s27_s15 }
   0x8   :  { %p915_p0 = scmp.ne.s32.totalorder %s27_s15, %s914_s16  ;;  %p920_p2 = scmp.lt.s32.totalorder %s914_s16, %s914_s16 }
   0xa   :  { %p921_p3 = por %p920_p2, %p919_p1 }
   0xc   :  { %p922_p4 = pnand %p921_p3, %p915_p0 }
   0xe   :  { %925 = shalt.err (!%p922_p4)
}
   0xf   :  { %s1181_s17 = smov [#allocation5]   ;;  %s1182_s18 = smov [#allocation9]  }
  0x10   :  { %29 = dma.vmem_to_smem %s27_s15, 16, %s1181_s17, [#allocation8]  }
  0x11   :  { %s37_s19 = sshll.u32 %s1182_s18, 4  ;;  %s38_s19 = int_to_ptr.vmem [resolvable:$true] %s37_s19 }
  0x12   :  { %s934_s20 = scalar_lea.vmem %s38_s19, 1024  ;;  %p939_p6 = scmp.lt.s32.totalorder %s38_s19, %s38_s19 }
  0x13   :  { %p935_p5 = scmp.ne.s32.totalorder %s38_s19, %s934_s20  ;;  %p940_p7 = scmp.lt.s32.totalorder %s934_s20, %s934_s20 }
  0x15   :  { %p941_p8 = por %p940_p7, %p939_p6 }
  0x17   :  { %p942_p9 = pnand %p941_p8, %p935_p5 }
  0x19   :  { %945 = shalt.err (!%p942_p9)
}
  0x1a   :  { %s1183_s0 = smov 64   ;;  %s1184_s21 = smov 4  }
  0x1b   :  { %43 = dma.hbm_to_vmem [thread:$0]  %s1449_s2, 1024, %s38_s19, [#allocation6], %s1183_s0, %s1183_s0, %s1184_s21  }
  0x1c   :  { %s1185_s24 = smov [#allocation10]  }
  0x1d   :  { %s51_s25 = sshll.u32 %s1185_s24, 4  ;;  %s52_s25 = int_to_ptr.vmem [resolvable:$true] %s51_s25 }
  0x1e   :  { %s954_s26 = scalar_lea.vmem %s52_s25, 2048  ;;  %p959_p11 = scmp.lt.s32.totalorder %s52_s25, %s52_s25 }
  0x1f   :  { %p955_p10 = scmp.ne.s32.totalorder %s52_s25, %s954_s26  ;;  %p960_p12 = scmp.lt.s32.totalorder %s954_s26, %s954_s26 }
  0x21   :  { %p961_p13 = por %p960_p12, %p959_p11 }
  0x23   :  { %p962_p0 = pnand %p961_p13, %p955_p10 }
  0x25   :  { %965 = shalt.err (!%p962_p0)
}
  0x26   :  { %57 = dma.hbm_to_vmem [thread:$0]  %s1452_s5, 2048, %s52_s25, [#allocation11], %s1183_s0, %s1183_s0, %s1184_s21  }
  0x27   :  { %1157 = dma.done.wait [#allocation8], 16  }
  0x28   :  { %1158 = vsyncadd [#allocation8], 4294967280 }
  0x29   :  { %1159 = dma.done.wait [#allocation6], 1024  }
  0x2a   :  { %1160 = vsyncadd [#allocation6], 4294966272 }
  0x2b   :  { %1161 = dma.done.wait [#allocation11], 2048  }
  0x2c   :  { %1162 = vsyncadd [#allocation11], 4294965248 }
  0x2d   :  { %75 = sfence }
  0x2e   :  { %v874_v0 = vld [vmem:[#allocation9 + $0x38] sm:$0xff]   ;;  %v1186_v1 = vmov 0.0   ;;  %v875_v2 = vld [vmem:[#allocation9 + $0x30] sm:$0xff]   ;;  %vm1187_vm0 = vmmov 0   ;;  %v876_v3 = vld [vmem:[#allocation9 + $0x28] sm:$0xff]   ;;  %s77_s11 = sld [smem:[#allocation5]] }
  0x2f   :  { %827 = vmatprep.subr.bf16.mxu0 %v1186_v1  ;;  %843 = vmatprep.mubr.msk.bf16.mxu0 %vm1187_vm0, %v1186_v1  ;;  %v877_v4 = vld [vmem:[#allocation9 + $0x20] sm:$0xff]   ;;  %v878_v5 = vld [vmem:[#allocation9 + $0x18] sm:$0xff]   ;;  %v879_v6 = vld [vmem:[#allocation9 + $0x10] sm:$0xff]   ;;  %s1284_s12 = sld [smem:[#allocation5 + $0x1]]  ;;  %s1188_s0 = smov [#allocation2]  }
  0x30   :  { %828 = vmatpush3.bf16.msra.mxu0 %v874_v0  ;;  %v880_v7 = vld [vmem:[#allocation9 + $0x8] sm:$0xff]   ;;  %v881_v8 = vld [vmem:[#allocation9] sm:$0xff]   ;;  %v194_v9 = vld [vmem:[%s1448_s1] sm:$0xf]  ;;  %s1286_s13 = sld [smem:[#allocation5 + $0x2]]  ;;  %s85_s21 = sshll.u32 %s1188_s0, 4  ;;  %s1299_s21 = int_to_ptr.vmem [resolvable:$true] %s85_s21 }
  0x31   :  { %829 = vmatprep.subr.bf16.mxu0 %v1186_v1  ;;  %v758_v10 = vld [vmem:[%s1450_s3] ss:$0 sm:$0xff]  ;;  %s1288_s1 = sld [smem:[#allocation5 + $0x3]]  ;;  %s1304_s28 = scalar_lea.hbm %s1451_s4, 4096 }
  0x32   :  { %s1290_s14 = sld [smem:[#allocation5 + $0x4]] }
  0x33   :  { %s1292_s3 = sld [smem:[#allocation5 + $0x5]] }
  0x34   :  { %830 = vmatpush3.bf16.msra.mxu0 %v875_v2  ;;  %s78_s15 = sshrl.u32 %s77_s11, 3  ;;  %s1294_s16 = sld [smem:[#allocation5 + $0x6]] }
  0x35   :  { %831 = vmatprep.subr.bf16.mxu0 %v1186_v1  ;;  %s79_s17 = sand.u32 7, %s77_s11   ;;  %s735_s18 = sshll.u32 %s78_s15, 4 }
  0x36   :  { %s81_s19 = sadd.s32 %s735_s18, %s79_s17 }
  0x37   :  { %s736_s20 = sshll.u32 %s81_s19, 4 }
  0x38   :  { %832 = vmatpush3.bf16.msra.mxu0 %v876_v3  ;;  %s83_s24 = scalar_lea.hbm %s1451_s4, %s736_s20 }
  0x39   :  { %833 = vmatprep.subr.bf16.mxu0 %v1186_v1  ;;  %s966_s25 = scalar_lea.hbm %s83_s24, 32  ;;  %p969_p2 = scmp.lt.s32.totalorder %s83_s24, %s1451_s4 }
  0x3a   :  { %p967_p1 = scmp.ne.s32.totalorder %s83_s24, %s966_s25  ;;  %p970_p3 = scmp.lt.s32.totalorder %s1304_s28, %s966_s25 }
  0x3c   :  { %834 = vmatpush3.bf16.msra.mxu0 %v877_v4  ;;  %p971_p4 = por %p970_p3, %p969_p2 }
  0x3d   :  { %835 = vmatprep.subr.bf16.mxu0 %v1186_v1 }
  0x3e   :  { %p972_p5 = pnand %p971_p4, %p967_p1 }
  0x40   :  { %836 = vmatpush3.bf16.msra.mxu0 %v878_v5 }
  0x41   :  { %837 = vmatprep.subr.bf16.mxu0 %v1186_v1 }
  0x44   :  { %838 = vmatpush3.bf16.msra.mxu0 %v879_v6 }
  0x45   :  { %839 = vmatprep.subr.bf16.mxu0 %v1186_v1 }
  0x48   :  { %840 = vmatpush3.bf16.msra.mxu0 %v880_v7 }
  0x49   :  { %841 = vmatprep.subr.bf16.mxu0 %v1186_v1 }
  0x4c   :  { %842 = vmatpush3.bf16.msra.mxu0 %v881_v8 }
  0x4f   :  { %844 = vmatmul.mubr.bf16.vlgmr.msra.gmra.mxu0 %v194_v9 }
 0x10f   :  { %v300_v11 = vpop.f32.mrf.mxu0 }
 0x110   :  { %v1280_v12 = vadd.f32 %v758_v10, %v300_v11 }
 0x111   :  { %v845_v13 = vpop.f32.mrf.mxu0 }
 0x112   :  { %v306_v14 = vmul.f32 %v1280_v12, %v1280_v12 }
 0x113   :  { %v303_v15 = vpop.f32.mrf.mxu0 }
 0x114   :  { %307 = vadd.xlane.f32.xlu0 %v306_v14 }
 0x115   :  { %v846_v16 = vpop.f32.mrf.mxu0 }
 0x116   :  { %975 = shalt.err (!%p972_p5)  }
 0x117   :  { %s976_s29 = scalar_lea.vmem %s1299_s21, 32  ;;  %s1313_s30 = scalar_lea.vmem %s1299_s21, 256 }
 0x118   :  { %p977_p6 = scmp.ne.s32.totalorder %s1299_s21, %s976_s29  ;;  %p981_p7 = scmp.lt.s32.totalorder %s1299_s21, %s1299_s21 }
 0x119   :  { %p982_p8 = scmp.lt.s32.totalorder %s1313_s30, %s976_s29 }
 0x11b   :  { %p983_p9 = por %p982_p8, %p981_p7 }
 0x11d   :  { %p984_p10 = pnand %p983_p9, %p977_p6 }
 0x11f   :  { %987 = shalt.err (!%p984_p10)  }
 0x120   :  { %s1189_s11 = smov 128   ;;  %s1190_s15 = smov 1  }
 0x121   :  { %88 = dma.hbm_to_vmem [thread:$0]  %s83_s24, 32, %s1299_s21, [#allocation3], %s1189_s11, %s1189_s11, %s1190_s15 }
 0x122   :  { %s90_s17 = sshrl.u32 %s1284_s12, 3  ;;  %s91_s18 = sand.u32 7, %s1284_s12  }
 0x123   :  { %s738_s19 = sshll.u32 %s90_s17, 4  ;;  %s1191_s0 = smov [#allocation2 + $0x1]  }
 0x124   :  { %s701_s20 = sadd.s32 %s738_s19, %s91_s18  ;;  %s100_s22 = sshll.u32 %s1191_s0, 4  ;;  %s101_s22 = int_to_ptr.vmem [resolvable:$true] %s100_s22 }
 0x125   :  { %s739_s23 = sshll.u32 %s701_s20, 4  ;;  %s105_s2 = sshrl.u32 %s1286_s13, 3 }
 0x126   :  { %s703_s27 = scalar_lea.hbm %s1451_s4, %s739_s23  ;;  %s106_s29 = sand.u32 7, %s1286_s13  }
 0x127   :  { %s704_s5 = scalar_lea.hbm %s703_s27, 512  ;;  %s1010_s10 = scalar_lea.hbm %s703_s27, 544 }
 0x128   :  { %p989_p11 = scmp.ne.s32.totalorder %s704_s5, %s1010_s10  ;;  %p991_p12 = scmp.lt.s32.totalorder %s704_s5, %s1451_s4 }
 0x129   :  { %p992_p13 = scmp.lt.s32.totalorder %s1304_s28, %s1010_s10 }
 0x12b   :  { %p993_p0 = por %p992_p13, %p991_p12 }
 0x12d   :  { %p994_p1 = pnand %p993_p0, %p989_p11 }
 0x12f   :  { %997 = shalt.err (!%p994_p1)  }
 0x130   :  { %s998_s12 = scalar_lea.vmem %s101_s22, 32  ;;  %p1003_p3 = scmp.lt.s32.totalorder %s101_s22, %s1299_s21 }
 0x131   :  { %p999_p2 = scmp.ne.s32.totalorder %s101_s22, %s998_s12  ;;  %p1004_p4 = scmp.lt.s32.totalorder %s1313_s30, %s998_s12 }
 0x133   :  { %p1005_p5 = por %p1004_p4, %p1003_p3 }
 0x135   :  { %p1006_p6 = pnand %p1005_p5, %p999_p2 }
 0x137   :  { %1009 = shalt.err (!%p1006_p6)  }
 0x138   :  { %103 = dma.hbm_to_vmem [thread:$0]  %s704_s5, 32, %s101_s22, [#allocation3 + $0x1], %s1189_s11, %s1189_s11, %s1190_s15 }
 0x139   :  { %s741_s9 = sshll.u32 %s105_s2, 4  ;;  %s1192_s13 = smov [#allocation2 + $0x2]  }
 0x13a   :  { %s706_s10 = sadd.s32 %s741_s9, %s106_s29  ;;  %s115_s17 = sshll.u32 %s1192_s13, 4  ;;  %s116_s17 = int_to_ptr.vmem [resolvable:$true] %s115_s17 }
 0x13b   :  { %s742_s18 = sshll.u32 %s706_s10, 4  ;;  %s120_s23 = sshrl.u32 %s1288_s1, 3 }
 0x13c   :  { %s708_s0 = scalar_lea.hbm %s1451_s4, %s742_s18  ;;  %s121_s26 = sand.u32 7, %s1288_s1  }
 0x13d   :  { %s709_s25 = scalar_lea.hbm %s708_s0, 1024  ;;  %s1033_s27 = scalar_lea.hbm %s708_s0, 1056 }
 0x13e   :  { %p1012_p7 = scmp.ne.s32.totalorder %s709_s25, %s1033_s27  ;;  %p1014_p8 = scmp.lt.s32.totalorder %s709_s25, %s1451_s4 }
 0x13f   :  { %p1015_p9 = scmp.lt.s32.totalorder %s1304_s28, %s1033_s27 }
 0x141   :  { %p1016_p10 = por %p1015_p9, %p1014_p8 }
 0x143   :  { %p1017_p11 = pnand %p1016_p10, %p1012_p7 }
 0x145   :  { %1020 = shalt.err (!%p1017_p11)  }
 0x146   :  { %s1021_s22 = scalar_lea.vmem %s116_s17, 32  ;;  %p1026_p13 = scmp.lt.s32.totalorder %s116_s17, %s1299_s21 }
 0x147   :  { %p1022_p12 = scmp.ne.s32.totalorder %s116_s17, %s1021_s22  ;;  %p1027_p0 = scmp.lt.s32.totalorder %s1313_s30, %s1021_s22 }
 0x149   :  { %p1028_p1 = por %p1027_p0, %p1026_p13 }
 0x14b   :  { %p1029_p2 = pnand %p1028_p1, %p1022_p12 }
 0x14d   :  { %1032 = shalt.err (!%p1029_p2)  }
 0x14e   :  { %118 = dma.hbm_to_vmem [thread:$0]  %s709_s25, 32, %s116_s17, [#allocation3 + $0x2], %s1189_s11, %s1189_s11, %s1190_s15 }
 0x14f   :  { %s744_s1 = sshll.u32 %s120_s23, 4  ;;  %s1193_s5 = smov [#allocation2 + $0x3]  }
 0x150   :  { %s711_s2 = sadd.s32 %s744_s1, %s121_s26  ;;  %s130_s29 = sshll.u32 %s1193_s5, 4  ;;  %s131_s29 = int_to_ptr.vmem [resolvable:$true] %s130_s29 }
 0x151   :  { %s745_s9 = sshll.u32 %s711_s2, 4  ;;  %s135_s19 = sshrl.u32 %s1290_s14, 3 }
 0x152   :  { %s713_s18 = scalar_lea.hbm %s1451_s4, %s745_s9  ;;  %s136_s0 = sand.u32 7, %s1290_s14  }
 0x153   :  { %s714_s20 = scalar_lea.hbm %s713_s18, 1536  ;;  %s1056_s27 = scalar_lea.hbm %s713_s18, 1568 }
 0x154   :  { %p1035_p3 = scmp.ne.s32.totalorder %s714_s20, %s1056_s27  ;;  %p1037_p4 = scmp.lt.s32.totalorder %s714_s20, %s1451_s4 }
 0x155   :  { %p1038_p5 = scmp.lt.s32.totalorder %s1304_s28, %s1056_s27 }
 0x157   :  { %p1039_p6 = por %p1038_p5, %p1037_p4 }
 0x159   :  { %p1040_p7 = pnand %p1039_p6, %p1035_p3 }
 0x15b   :  { %1043 = shalt.err (!%p1040_p7)  }
 0x15c   :  { %s1044_s17 = scalar_lea.vmem %s131_s29, 32  ;;  %p1049_p9 = scmp.lt.s32.totalorder %s131_s29, %s1299_s21 }
 0x15d   :  { %p1045_p8 = scmp.ne.s32.totalorder %s131_s29, %s1044_s17  ;;  %p1050_p10 = scmp.lt.s32.totalorder %s1313_s30, %s1044_s17 }
 0x15f   :  { %p1051_p11 = por %p1050_p10, %p1049_p9 }
 0x161   :  { %p1052_p12 = pnand %p1051_p11, %p1045_p8 }
 0x163   :  { %1055 = shalt.err (!%p1052_p12)  }
 0x164   :  { %133 = dma.hbm_to_vmem [thread:$0]  %s714_s20, 32, %s131_s29, [#allocation3 + $0x3], %s1189_s11, %s1189_s11, %s1190_s15 }
 0x165   :  { %s747_s14 = sshll.u32 %s135_s19, 4  ;;  %s1194_s25 = smov [#allocation2 + $0x4]  }
 0x166   :  { %s716_s23 = sadd.s32 %s747_s14, %s136_s0  ;;  %s145_s26 = sshll.u32 %s1194_s25, 4  ;;  %s146_s26 = int_to_ptr.vmem [resolvable:$true] %s145_s26 }
 0x167   :  { %s748_s22 = sshll.u32 %s716_s23, 4  ;;  %s150_s9 = sshrl.u32 %s1292_s3, 3 }
 0x168   :  { %s718_s5 = scalar_lea.hbm %s1451_s4, %s748_s22  ;;  %s151_s13 = sand.u32 7, %s1292_s3  }
 0x169   :  { %s719_s10 = scalar_lea.hbm %s718_s5, 2048  ;;  %s1079_s18 = scalar_lea.hbm %s718_s5, 2080 }
 0x16a   :  { %p1058_p13 = scmp.ne.s32.totalorder %s719_s10, %s1079_s18  ;;  %p1060_p0 = scmp.lt.s32.totalorder %s719_s10, %s1451_s4 }
 0x16b   :  { %p1061_p1 = scmp.lt.s32.totalorder %s1304_s28, %s1079_s18 }
 0x16d   :  { %p1062_p2 = por %p1061_p1, %p1060_p0 }
 0x16f   :  { %p1063_p3 = pnand %p1062_p2, %p1058_p13 }
 0x171   :  { %1066 = shalt.err (!%p1063_p3)  }
 0x172   :  { %s1067_s29 = scalar_lea.vmem %s146_s26, 32  ;;  %p1072_p5 = scmp.lt.s32.totalorder %s146_s26, %s1299_s21 }
 0x173   :  { %p1068_p4 = scmp.ne.s32.totalorder %s146_s26, %s1067_s29  ;;  %p1073_p6 = scmp.lt.s32.totalorder %s1313_s30, %s1067_s29 }
 0x175   :  { %p1074_p7 = por %p1073_p6, %p1072_p5 }
 0x177   :  { %p1075_p8 = pnand %p1074_p7, %p1068_p4 }
 0x179   :  { %1078 = shalt.err (!%p1075_p8)  }
 0x17a   :  { %148 = dma.hbm_to_vmem [thread:$0]  %s719_s10, 32, %s146_s26, [#allocation3 + $0x4], %s1189_s11, %s1189_s11, %s1190_s15 }
 0x17b   :  { %s750_s3 = sshll.u32 %s150_s9, 4  ;;  %s1195_s20 = smov [#allocation2 + $0x5]  }
 0x17c   :  { %s721_s19 = sadd.s32 %s750_s3, %s151_s13  ;;  %s160_s0 = sshll.u32 %s1195_s20, 4  ;;  %s161_s0 = int_to_ptr.vmem [resolvable:$true] %s160_s0 }
 0x17d   :  { %s751_s12 = sshll.u32 %s721_s19, 4  ;;  %s165_s25 = sshrl.u32 %s1294_s16, 3 }
 0x17e   :  { %s723_s23 = scalar_lea.hbm %s1451_s4, %s751_s12  ;;  %s166_s1 = sand.u32 7, %s1294_s16  }
 0x17f   :  { %s724_s22 = scalar_lea.hbm %s723_s23, 2560  ;;  %s1102_s2 = scalar_lea.hbm %s723_s23, 2592 }
 0x180   :  { %p1081_p9 = scmp.ne.s32.totalorder %s724_s22, %s1102_s2  ;;  %p1083_p10 = scmp.lt.s32.totalorder %s724_s22, %s1451_s4 }
 0x181   :  { %p1084_p11 = scmp.lt.s32.totalorder %s1304_s28, %s1102_s2 }
 0x183   :  { %p1085_p12 = por %p1084_p11, %p1083_p10 }
 0x185   :  { %p1086_p13 = pnand %p1085_p12, %p1081_p9 }
 0x187   :  { %1089 = shalt.err (!%p1086_p13)  }
 0x188   :  { %s1090_s26 = scalar_lea.vmem %s161_s0, 32  ;;  %p1095_p1 = scmp.lt.s32.totalorder %s161_s0, %s1299_s21 }
 0x189   :  { %p1091_p0 = scmp.ne.s32.totalorder %s161_s0, %s1090_s26  ;;  %p1096_p2 = scmp.lt.s32.totalorder %s1313_s30, %s1090_s26 }
 0x18b   :  { %p1097_p3 = por %p1096_p2, %p1095_p1 }
 0x18d   :  { %p1098_p4 = pnand %p1097_p3, %p1091_p0 }
 0x18f   :  { %1101 = shalt.err (!%p1098_p4)  }
 0x190   :  { %163 = dma.hbm_to_vmem [thread:$0]  %s724_s22, 32, %s161_s0, [#allocation3 + $0x5], %s1189_s11, %s1189_s11, %s1190_s15 }
 0x191   :  { %s753_s16 = sshll.u32 %s165_s25, 4  ;;  %s1196_s10 = smov [#allocation2 + $0x6]  }
 0x192   :  { %s726_s9 = sadd.s32 %s753_s16, %s166_s1  ;;  %s175_s13 = sshll.u32 %s1196_s10, 4  ;;  %s176_s13 = int_to_ptr.vmem [resolvable:$true] %s175_s13 }
 0x193   :  { %s754_s27 = sshll.u32 %s726_s9, 4  ;;  %s755_s19 = sld [smem:[#allocation5 + $0x7]] }
 0x194   :  { %s728_s3 = scalar_lea.hbm %s1451_s4, %s754_s27 }
 0x195   :  { %s729_s20 = scalar_lea.hbm %s728_s3, 3072  ;;  %s1125_s12 = scalar_lea.hbm %s728_s3, 3104 }
 0x196   :  { %p1104_p5 = scmp.ne.s32.totalorder %s729_s20, %s1125_s12  ;;  %p1106_p6 = scmp.lt.s32.totalorder %s729_s20, %s1451_s4 }
 0x197   :  { %p1107_p7 = scmp.lt.s32.totalorder %s1304_s28, %s1125_s12 }
 0x199   :  { %p1108_p8 = por %p1107_p7, %p1106_p6 }
 0x19b   :  { %p1109_p9 = pnand %p1108_p8, %p1104_p5 }
 0x19d   :  { %1112 = shalt.err (!%p1109_p9)  }
 0x19e   :  { %s1113_s0 = scalar_lea.vmem %s176_s13, 32  ;;  %p1118_p11 = scmp.lt.s32.totalorder %s176_s13, %s1299_s21 }
 0x19f   :  { %p1114_p10 = scmp.ne.s32.totalorder %s176_s13, %s1113_s0  ;;  %p1119_p12 = scmp.lt.s32.totalorder %s1313_s30, %s1113_s0 }
 0x1a1   :  { %p1120_p13 = por %p1119_p12, %p1118_p11 }
 0x1a3   :  { %p1121_p0 = pnand %p1120_p13, %p1114_p10 }
 0x1a5   :  { %1124 = shalt.err (!%p1121_p0)  }
 0x1a6   :  { %178 = dma.hbm_to_vmem [thread:$0]  %s729_s20, 32, %s176_s13, [#allocation3 + $0x6], %s1189_s11, %s1189_s11, %s1190_s15 }
 0x1a7   :  { %s1197_s23 = smov [#allocation2 + $0x7]   ;;  %s180_s22 = sshrl.u32 %s755_s19, 3 }
 0x1a8   :  { %s190_s25 = sshll.u32 %s1197_s23, 4  ;;  %s181_s1 = sand.u32 7, %s755_s19   ;;  %s191_s25 = int_to_ptr.vmem [resolvable:$true] %s190_s25 }
 0x1a9   :  { %s756_s2 = sshll.u32 %s180_s22, 4 }
 0x1aa   :  { %s731_s5 = sadd.s32 %s756_s2, %s181_s1 }
 0x1ab   :  { %s757_s18 = sshll.u32 %s731_s5, 4 }
 0x1ac   :  { %s733_s9 = scalar_lea.hbm %s1451_s4, %s757_s18 }
 0x1ad   :  { %s734_s10 = scalar_lea.hbm %s733_s9, 3584  ;;  %s1148_s27 = scalar_lea.hbm %s733_s9, 3616 }
 0x1ae   :  { %p1127_p1 = scmp.ne.s32.totalorder %s734_s10, %s1148_s27  ;;  %p1129_p2 = scmp.lt.s32.totalorder %s734_s10, %s1451_s4 }
 0x1af   :  { %p1130_p3 = scmp.lt.s32.totalorder %s1304_s28, %s1148_s27 }
 0x1b1   :  { %p1131_p4 = por %p1130_p3, %p1129_p2 }
 0x1b3   :  { %p1132_p5 = pnand %p1131_p4, %p1127_p1 }
 0x1b5   :  { %1135 = shalt.err (!%p1132_p5)  }
 0x1b6   :  { %s1136_s13 = scalar_lea.vmem %s191_s25, 32  ;;  %p1141_p7 = scmp.lt.s32.totalorder %s191_s25, %s1299_s21 }
 0x1b7   :  { %p1137_p6 = scmp.ne.s32.totalorder %s191_s25, %s1136_s13  ;;  %p1142_p8 = scmp.lt.s32.totalorder %s1313_s30, %s1136_s13 }
 0x1b9   :  { %p1143_p9 = por %p1142_p8, %p1141_p7 }
 0x1bb   :  { %p1144_p10 = pnand %p1143_p9, %p1137_p6 }
 0x1bd   :  { %1147 = shalt.err (!%p1144_p10)  }
 0x1be   :  { %193 = dma.hbm_to_vmem [thread:$0]  %s734_s10, 32, %s191_s25, [#allocation3 + $0x7], %s1189_s11, %s1189_s11, %s1190_s15  ;;  %v308_v17 = vpop.xlane.xlu0 %307 }
 0x1bf   :  { %v309_v18 = vmax.f32 %v308_v17, 1e-24 }
 0x1c1   :  { %882 = vrsqrt.f32 %v309_v18 }
 0x1ce   :  { %v883_v19 = vpop.eup %882 }
 0x1cf   :  { %v1419_v20 = vmul.f32 %v883_v19, %v1280_v12 }
 0x1d0   :  { %1163 = dma.done.wait [#allocation3], 32 }
 0x1d1   :  { %1164 = vsyncadd [#allocation3], 4294967264 }
 0x1d2   :  { %1165 = dma.done.wait [#allocation3 + $0x1], 32 }
 0x1d3   :  { %1166 = vsyncadd [#allocation3 + $0x1], 4294967264 }
 0x1d4   :  { %1167 = dma.done.wait [#allocation3 + $0x2], 32 }
 0x1d5   :  { %1168 = vsyncadd [#allocation3 + $0x2], 4294967264 }
 0x1d6   :  { %1169 = dma.done.wait [#allocation3 + $0x3], 32 }
 0x1d7   :  { %1170 = vsyncadd [#allocation3 + $0x3], 4294967264 }
 0x1d8   :  { %1171 = dma.done.wait [#allocation3 + $0x4], 32 }
 0x1d9   :  { %1172 = vsyncadd [#allocation3 + $0x4], 4294967264 }
 0x1da   :  { %1173 = dma.done.wait [#allocation3 + $0x5], 32 }
 0x1db   :  { %1174 = vsyncadd [#allocation3 + $0x5], 4294967264 }
 0x1dc   :  { %1175 = dma.done.wait [#allocation3 + $0x6], 32 }
 0x1dd   :  { %1176 = vsyncadd [#allocation3 + $0x6], 4294967264 }
 0x1de   :  { %1177 = dma.done.wait [#allocation3 + $0x7], 32 }
 0x1df   :  { %1178 = vsyncadd [#allocation3 + $0x7], 4294967264  ;;  %847 = vmatprep.subr.bf16.mxu0 %v1186_v1  ;;  %849 = vmatprep.mubr.msk.bf16.mxu0 %vm1187_vm0, %v1186_v1  ;;  %v886_v21 = vld [vmem:[#allocation10 + $0x78] sm:$0xff]   ;;  %v888_v23 = vld [vmem:[#allocation10 + $0x70] sm:$0xff]   ;;  %v1198_v50 = vmov 0   ;;  %v515_v56 = vpack.c.bf16 %v1419_v20, %v1419_v20  ;;  %s1460_s3 = sld [smem:[#allocation33_spill]] }
 0x1e0   :  { %v887_v22 = vld [vmem:[#allocation10 + $0x38] sm:$0xff]   ;;  %803 = vmatprep.subr.bf16.mxu1 %v886_v21  ;;  %v889_v24 = vld [vmem:[#allocation10 + $0x30] sm:$0xff]   ;;  %v890_v25 = vld [vmem:[#allocation10 + $0x68] sm:$0xff]   ;;  %884 = vset.pattern.permute.xlu1 %v1198_v50  ;;  %vm571_vm2 = vcmask 64512   ;;  %s1199_s20 = smov [#allocation12]   ;;  %s1461_s14 = sld [smem:[#allocation34_spill]] }
 0x1e1   :  { %804 = vmatpush3.bf16.msra.mxu1 %v887_v22  ;;  %v891_v26 = vld [vmem:[#allocation10 + $0x28] sm:$0xff]   ;;  %v892_v27 = vld [vmem:[#allocation10 + $0x60] sm:$0xff]   ;;  %v894_v29 = vld [vmem:[#allocation10 + $0x58] sm:$0xff]   ;;  %885 = vset.pattern.permute.xlu0 %v1198_v50 }
 0x1e2   :  { %805 = vmatprep.subr.bf16.mxu1 %v888_v23  ;;  %v893_v28 = vld [vmem:[#allocation10 + $0x20] sm:$0xff]   ;;  %v895_v30 = vld [vmem:[#allocation10 + $0x18] sm:$0xff]   ;;  %v896_v31 = vld [vmem:[#allocation10 + $0x50] sm:$0xff]  }
 0x1e3   :  { %v330_v32 = vld [vmem:[#allocation2 + $0x8] sm:$0xff]  ;;  %v897_v34 = vld [vmem:[#allocation10 + $0x10] sm:$0xff]   ;;  %v898_v35 = vld [vmem:[#allocation10 + $0x48] sm:$0xff]  }
 0x1e4   :  { %v332_v33 = vpack.c.bf16 %v330_v32, %v330_v32  ;;  %v899_v36 = vld [vmem:[#allocation10 + $0x8] sm:$0xff]   ;;  %v900_v37 = vld [vmem:[#allocation10 + $0x40] sm:$0xff]   ;;  %v329_v39 = vld [vmem:[#allocation2] sm:$0xff] }
 0x1e5   :  { %806 = vmatpush3.bf16.msra.mxu1 %v889_v24  ;;  %v901_v38 = vld [vmem:[#allocation10] sm:$0xff]   ;;  %v331_v40 = vpack.c.bf16 %v329_v39, %v329_v39  ;;  %v767_v43 = vld [vmem:[%s1453_s6] ss:$0 sm:$0xff]  ;;  %v557_v59 = vstv %s1460_s3 }
 0x1e6   :  { %807 = vmatprep.subr.bf16.mxu1 %v890_v25  ;;  %500 = vmatprep.mubr.bf16.mxu1 %v332_v33  ;;  %v559_v49 = vld [vmem:[%s1454_s7] sm:$0xff] }
 0x1e7   :  { %562 = vperm.xlu1 %884, %v559_v49   ;;  %v784_v57 = vld [vmem:[%s1455_s8] ss:$0 sm:$0xff] }
 0x1e9   :  { %808 = vmatpush3.bf16.msra.mxu1 %v891_v26 }
 0x1ea   :  { %809 = vmatprep.subr.bf16.mxu1 %v892_v27 }
 0x1ed   :  { %810 = vmatpush3.bf16.msra.mxu1 %v893_v28 }
 0x1ee   :  { %811 = vmatprep.subr.bf16.mxu1 %v894_v29 }
 0x1f1   :  { %812 = vmatpush3.bf16.msra.mxu1 %v895_v30 }
 0x1f2   :  { %813 = vmatprep.subr.bf16.mxu1 %v896_v31 }
 0x1f5   :  { %814 = vmatpush3.bf16.msra.mxu1 %v897_v34 }
 0x1f6   :  { %815 = vmatprep.subr.bf16.mxu1 %v898_v35 }
 0x1f9   :  { %816 = vmatpush3.bf16.msra.mxu1 %v899_v36 }
 0x1fa   :  { %817 = vmatprep.subr.bf16.mxu1 %v900_v37 }
 0x1fd   :  { %818 = vmatpush3.bf16.msra.mxu1 %v901_v38 }
 0x200   :  { %501 = vmatmul.mubr.bf16.vlgmr.msra.gmra.mxu1 %v331_v40 }
 0x262   :  { %v563_v58 = vpop.permute.xlu1 %562 }
 0x263   :  { %vm568_vm1 = vcmp.eq.s32.totalorder %v563_v58, %v784_v57 }
 0x264   :  { %v785_v63 = vsel %vm568_vm1, 1.0, %v1186_v1 }
 0x265   :  { %v572_v3 = vsel %vm571_vm2, %v785_v63, 0.0 }
 0x2c0   :  { %v819_v41 = vpop.f32.mrf.mxu1 }
 0x2c2   :  { %v820_v42 = vpop.f32.mrf.mxu1 }
 0x2c3   :  { %v821_v44 = vadd.f32 %v820_v42, %v819_v41 }
 0x2c4   :  { %v822_v45 = vpop.f32.mrf.mxu1 }
 0x2c5   :  { %v503_v46 = vadd.f32 %v821_v44, %v767_v43 }
 0x2c6   :  { %v823_v47 = vpop.f32.mrf.mxu1 }
 0x2c7   :  { %v508_v48 = vmul.f32 %v503_v46, %v503_v46 }
 0x2c9   :  { %509 = vadd.xlane.f32.xlu0 %v508_v48 }
 0x352   :  { %v510_v51 = vpop.xlane.xlu0 %509 }
 0x353   :  { %v511_v52 = vmax.f32 %v510_v51, 1e-24 }
 0x355   :  { %902 = vrsqrt.f32 %v511_v52 }
 0x362   :  { %v903_v53 = vpop.eup %902 }
 0x363   :  { %v513_v54 = vmul.f32 %v903_v53, %v503_v46 }
 0x365   :  { %v516_v55 = vpack.c.bf16 %v513_v54, %v513_v54 }
 0x367   :  { %848 = vmatpush3.bf16.xpose.msra.mxu0 %v516_v55 }
 0x36e   :  { %850 = vmatmul.mubr.bf16.vlgmr.msra.gmra.mxu0 %v515_v56 }
 0x42e   :  { %v551_v60 = vpop.f32.mrf.mxu0 }
 0x42f   :  { %v558_v61 = vmul.f32 %v557_v59, %v551_v60 }
 0x430   :  { %v851_v62 = vpop.f32.mrf.mxu0 }
 0x431   :  { %v577_v0 = vsel %vm571_vm2, %v558_v61, -inf  ;;  %v608_v32 = vmul.f32 2.0, %v558_v61 }
 0x432   :  { %578 = vmax.xlane.f32.xlu0 %v577_v0  ;;  %v554_v2 = vpop.f32.mrf.mxu0  ;;  %v589_v10 = vrot.slane %v577_v0, 4 }
 0x434   :  { %v852_v4 = vpop.f32.mrf.mxu0  ;;  %v590_v11 = vmax.f32 %v577_v0, %v589_v10 }
 0x436   :  { %573 = vadd.xlane.f32.xlu0 %v572_v3  ;;  %v591_v12 = vrot.slane %v590_v11, 2 }
 0x438   :  { %v592_v1 = vmax.f32 %v590_v11, %v591_v12 }
 0x43a   :  { %v593_v13 = vrot.slane %v592_v1, 1 }
 0x43c   :  { %v594_v14 = vmax.f32 %v592_v1, %v593_v13 }
 0x43e   :  { %v595_v15 = vsub.f32 %v558_v61, %v594_v14 }
 0x440   :  { %v596_v16 = vmul.f32 1.442695, %v595_v15 }
 0x4bb   :  { %v579_v5 = vpop.xlane.xlu0 %578 }
 0x4bc   :  { %v580_v6 = vsub.f32 %v558_v61, %v579_v5 }
 0x4be   :  { %v581_v7 = vmul.f32 1.442695, %v580_v6 }
 0x4bf   :  { %v574_v26 = vpop.xlane.xlu0 %573 }
 0x4c0   :  { %904 = vpow2.f32 %v581_v7 }
 0x4c1   :  { %906 = vpow2.f32 %v596_v16 }
 0x4cd   :  { %v905_v8 = vpop.eup %904 }
 0x4ce   :  { %v583_v9 = vsel %vm571_vm2, %v905_v8, 0.0  ;;  %v907_v17 = vpop.eup %906 }
 0x4cf   :  { %584 = vadd.xlane.f32.xlu1 %v583_v9  ;;  %v598_v18 = vsel %vm571_vm2, %v907_v17, 0.0 }
 0x4d0   :  { %v599_v19 = vrot.slane %v598_v18, 4 }
 0x4d2   :  { %v600_v20 = vadd.f32 %v599_v19, %v598_v18 }
 0x4d4   :  { %v601_v21 = vrot.slane %v600_v20, 2 }
 0x4d6   :  { %v602_v22 = vadd.f32 %v601_v21, %v600_v20 }
 0x4d8   :  { %v603_v23 = vrot.slane %v602_v22, 1 }
 0x4da   :  { %v604_v24 = vadd.f32 %v603_v23, %v602_v22 }
 0x4dc   :  { %908 = vlog2.f32 %v604_v24 }
 0x4e9   :  { %v909_v27 = vpop.eup %908 }
 0x4ea   :  { %v606_v30 = vmul.f32 0.6931472, %v909_v27 }
 0x4ec   :  { %v607_v34 = vadd.f32 %v606_v30, %v594_v14 }
 0x558   :  { %v585_v25 = vpop.xlane.xlu1 %584 }
 0x559   :  { %910 = vlog2.f32 %v585_v25 }
 0x55a   :  { %912 = vrcp.f32 %v574_v26 }
 0x566   :  { %v911_v28 = vpop.eup %910 }
 0x567   :  { %v587_v29 = vmul.f32 0.6931472, %v911_v28  ;;  %v913_v33 = vpop.eup %912 }
 0x568   :  { %v576_v36 = vmul.f32 %v913_v33, %v785_v63 }
 0x569   :  { %v588_v31 = vadd.f32 %v587_v29, %v579_v5 }
 0x56b   :  { %v609_v35 = vsub.f32 %v608_v32, %v588_v31 }
 0x56d   :  { %v610_v37 = vsub.f32 %v609_v35, %v607_v34 }
 0x56f   :  { %v611_v38 = vmul.f32 %v610_v37, %v576_v36 }
 0x571   :  { %v612_v39 = vsel %vm571_vm2, %v611_v38, 0.0 }
 0x572   :  { %613 = vadd.xlane.f32.xlu0 %v612_v39 }
 0x5fb   :  { %v614_v40 = vpop.xlane.xlu0 %613 }
 0x5fc   :  { %v615_v41 = vrot.slane %v614_v40, 4 }
 0x5fe   :  { %v616_v42 = vadd.f32 %v615_v41, %v614_v40 }
 0x600   :  { %v617_v43 = vrot.slane %v616_v42, 2 }
 0x602   :  { %v618_v44 = vadd.f32 %v617_v43, %v616_v42 }
 0x604   :  { %v619_v45 = vrot.slane %v618_v44, 1 }
 0x606   :  { %v620_v46 = vadd.f32 %v619_v45, %v618_v44 }
 0x608   :  { %853 = vpush %v620_v46 }
 0x639   :  { %s854_s8 = spop %853 }
 0x63a   :  { %s622_s19 = smul.f32 -0.0625, %s854_s8 }
 0x63c   :  { %624 = sst [smem:[#allocation12]] %s622_s19 }
 0x63d   :  { %632 = dma.smem_to_hbm %s1199_s20, 16, %s1461_s14, [#allocation7]  }
 0x63e   :  { %1179 = dma.done.wait [#allocation7], 16  }
 0x63f   :  { %1180 = vsyncadd [#allocation7], 4294967280 }
 0x640   :  { %636 = sfence }
 0x641   :  { %637 = vsyncpa [#allocation6], 1 }
 0x642   :  { %638 = vsyncpa [#allocation11], 1 }
 0x643   :  { %639 = vsyncpa [#allocation7], 1 }
 0x644   :  { %640 = vsyncpa [#allocation8], 1 }
 0x645   :  { %641 = vsyncmov [#allocation3] }
 0x648   :  { %s642_s0 = vpop.sfrf %641 }
 0x649   :  { %p786_p11 = scmp.ne.s32.totalorder %s642_s0, 0 }
 0x64b   :  { %646 = shalt.err (%p786_p11)  }
 0x64c   :  { %648 = vsyncmov [#allocation3 + $0x1] }
 0x64f   :  { %s649_s23 = vpop.sfrf %648 }
 0x650   :  { %p787_p12 = scmp.ne.s32.totalorder %s649_s23, 0 }
 0x652   :  { %653 = shalt.err (%p787_p12)  }
 0x653   :  { %655 = vsyncmov [#allocation3 + $0x2] }
 0x656   :  { %s656_s25 = vpop.sfrf %655 }
 0x657   :  { %p788_p13 = scmp.ne.s32.totalorder %s656_s25, 0 }
 0x659   :  { %660 = shalt.err (%p788_p13)  }
 0x65a   :  { %662 = vsyncmov [#allocation3 + $0x3] }
 0x65d   :  { %s663_s22 = vpop.sfrf %662 }
 0x65e   :  { %p789_p0 = scmp.ne.s32.totalorder %s663_s22, 0 }
 0x660   :  { %667 = shalt.err (%p789_p0)  }
 0x661   :  { %669 = vsyncmov [#allocation3 + $0x4] }
 0x664   :  { %s670_s1 = vpop.sfrf %669 }
 0x665   :  { %p790_p1 = scmp.ne.s32.totalorder %s670_s1, 0 }
 0x667   :  { %674 = shalt.err (%p790_p1)  }
 0x668   :  { %676 = vsyncmov [#allocation3 + $0x5] }
 0x66b   :  { %s677_s2 = vpop.sfrf %676 }
 0x66c   :  { %p791_p2 = scmp.ne.s32.totalorder %s677_s2, 0 }
 0x66e   :  { %681 = shalt.err (%p791_p2)  }
 0x66f   :  { %683 = vsyncmov [#allocation3 + $0x6] }
 0x672   :  { %s684_s5 = vpop.sfrf %683 }
 0x673   :  { %p792_p3 = scmp.ne.s32.totalorder %s684_s5, 0 }
 0x675   :  { %688 = shalt.err (%p792_p3)  }
 0x676   :  { %690 = vsyncmov [#allocation3 + $0x7] }
 0x679   :  { %s691_s18 = vpop.sfrf %690 }
 0x67a   :  { %p793_p4 = scmp.ne.s32.totalorder %s691_s18, 0 }
 0x67c   :  { %695 = shalt.err (%p793_p4)  }

</bundles_post_ra>
